<compile_context>
chip_gen: v5e
topology: v5e:2x2
jax: 0.10.0
libtpu: 0.0.40
codegen_flags: <defaults>
</compile_context>

<pallas_src>
import math

import jax
import jax.numpy as jnp
from jax.experimental import pallas as pl
from jax.experimental.pallas import tpu as pltpu

_EPS = 1e-5
# bf16 matmul inputs (f32 accumulate): MXU-native rate on v6e/v7x and halves the
# memory traffic of this bandwidth-bound op.  Set to jnp.float32 to disable.
_MATMUL_DTYPE = jnp.bfloat16


# ----------------------------- Pallas kernels ------------------------------ #

def _conv_matmul_kernel(p_ref, w_ref, o_ref):
    # p: (tm, K) bf16, w: (K, Cout) bf16 (VMEM-resident), o: (tm, Cout) f32.
    o_ref[...] = jnp.dot(
        p_ref[...], w_ref[...], preferred_element_type=jnp.float32
    ).astype(o_ref.dtype)


def _conv_matmul_res_kernel(p_ref, w_ref, r_ref, o_ref):
    # Same as above, with the residual (shortcut) add fused into the epilogue.
    acc = jnp.dot(p_ref[...], w_ref[...], preferred_element_type=jnp.float32)
    o_ref[...] = (acc + r_ref[...].astype(jnp.float32)).astype(o_ref.dtype)


# ----------------------------- Pallas wrappers ----------------------------- #

def _pick_row_tile(m, max_tile=1024):
    """Largest candidate row tile dividing m, capped at m//2 so the parallel grid
    has at least 2 blocks (both v7x TensorCores get work), bounded by max_tile."""
    cap = min(max_tile, m // 2) if m >= 16 else m
    for t in (1024, 512, 256, 128, 64, 32, 16, 8):
        if t <= cap and m % t == 0:
            return t
    # Awkward M: single full-size block, but only if it is safely small for VMEM.
    assert m <= 2048, f"no row tile found for M={m}; add masked/partial tiling"
    return m


def _matmul_residual_pallas(patches, wmat, residual, out_dtype):
    """out = patches @ wmat (+ residual): one lane-contiguous MXU contraction."""
    M, K = patches.shape
    _, Cout = wmat.shape
    tm = _pick_row_tile(M)

    in_specs = [
        pl.BlockSpec((tm, K), lambda i: (i, 0)),      # patch row tile
        pl.BlockSpec((K, Cout), lambda i: (0, 0)),    # weights: resident in VMEM
    ]
    operands = [patches, wmat]
    if residual is None:
        kernel = _conv_matmul_kernel
    else:
        in_specs.append(pl.BlockSpec((tm, Cout), lambda i: (i, 0)))
        operands.append(residual)
        kernel = _conv_matmul_res_kernel

    return pl.pallas_call(
        kernel,
        out_shape=jax.ShapeDtypeStruct((M, Cout), out_dtype),
        grid=(M // tm,),
        in_specs=in_specs,
        out_specs=pl.BlockSpec((tm, Cout), lambda i: (i, 0)),
        compiler_params=pltpu.CompilerParams(
            dimension_semantics=("parallel",),
            vmem_limit_bytes=32 * 1024 * 1024,
        ),
    )(*operands)


def conv2d_pallas(act, w_hwio, stride, residual=None):
    """Conv of an already BN+ReLU'd NHWC input.

    act: (N, H, W, Cin);  w_hwio: (kh, kw, Cin, Cout).  'same' padding for 3x3,
    no padding for 1x1.  Optional residual (N, Ho, Wo, Cout) fused in-kernel.
    """
    N, H, W, Cin = act.shape
    kh, kw, _, Cout = w_hwio.shape
    pad = (kh - 1) // 2
    Ho = (H + 2 * pad - kh) // stride + 1
    Wo = (W + 2 * pad - kw) // stride + 1
    M, K = N * Ho * Wo, kh * kw * Cin

    if pad:
        act = jnp.pad(act, ((0, 0), (pad, pad), (pad, pad), (0, 0)))
    cols = [
        act[:, ih:ih + stride * Ho:stride, iw:iw + stride * Wo:stride, :]
        for ih in range(kh) for iw in range(kw)
    ]
    # Single (M, K) im2col slab with K on the lane axis; built in one fused XLA
    # pass together with the upstream folded BN+ReLU.
    # TODO(synk): gather the shifted windows in-kernel via manual DMA from the
    # padded NHWC tensor to avoid materializing the K-times-larger patch slab.
    patches = jnp.concatenate(cols, axis=-1).reshape(M, K).astype(_MATMUL_DTYPE)
    wmat = w_hwio.reshape(K, Cout).astype(_MATMUL_DTYPE)

    res2d = None if residual is None else residual.reshape(M, Cout)
    out2d = _matmul_residual_pallas(patches, wmat, res2d, out_dtype=jnp.float32)
    return out2d.reshape(N, Ho, Wo, Cout)


# ------------------------- BasicBlock / NetworkBlock ----------------------- #

def _bn_fold(gamma, beta, mean, var):
    scale = gamma / jnp.sqrt(var + _EPS)
    return scale, beta - mean * scale


def _bn_relu(x, scale, shift):
    # Folded eval-mode BN + ReLU, in f32.  Plain jnp on purpose: XLA fuses it into
    # the im2col patch producer, so there is no standalone activation round trip
    # to HBM (this replaces the previous dedicated Pallas BN kernel).
    return jnp.maximum(x * scale + shift, 0.0)


def init_basic_block_params(key, in_planes, out_planes):
    ks = jax.random.split(key, 11)
    p = {}
    # BN1 (over in_planes), BN2 (over out_planes): eval-mode running stats.
    p["bn1_gamma"] = 1.0 + 0.1 * jax.random.normal(ks[0], (in_planes,), jnp.float32)
    p["bn1_beta"] = 0.1 * jax.random.normal(ks[1], (in_planes,), jnp.float32)
    p["bn1_mean"] = 0.1 * jax.random.normal(ks[2], (in_planes,), jnp.float32)
    p["bn1_var"] = jax.random.uniform(ks[3], (in_planes,), jnp.float32, 0.5, 1.5)
    p["bn2_gamma"] = 1.0 + 0.1 * jax.random.normal(ks[4], (out_planes,), jnp.float32)
    p["bn2_beta"] = 0.1 * jax.random.normal(ks[5], (out_planes,), jnp.float32)
    p["bn2_mean"] = 0.1 * jax.random.normal(ks[6], (out_planes,), jnp.float32)
    p["bn2_var"] = jax.random.uniform(ks[7], (out_planes,), jnp.float32, 0.5, 1.5)
    # Conv weights in HWIO layout (PyTorch OIHW <-> transpose(2,3,1,0)).
    p["conv1_w"] = jax.random.normal(ks[8], (3, 3, in_planes, out_planes), jnp.float32) \
        * math.sqrt(2.0 / (9 * in_planes))
    p["conv2_w"] = jax.random.normal(ks[9], (3, 3, out_planes, out_planes), jnp.float32) \
        * math.sqrt(2.0 / (9 * out_planes))
    if in_planes != out_planes:
        p["sc_w"] = jax.random.normal(ks[10], (1, 1, in_planes, out_planes), jnp.float32) \
            * math.sqrt(2.0 / in_planes)
    return p


def basic_block_forward(x, p, stride):
    """x: (N, H, W, Cin) NHWC."""
    in_p = x.shape[-1]
    out_p = p["conv1_w"].shape[-1]
    equal_in_out = in_p == out_p  # matches WRN BasicBlock.equalInOut
    if equal_in_out:
        # Identity shortcut only makes sense at stride 1 (otherwise the fused
        # residual add would mismatch shapes); standard WRN never violates this.
        assert stride == 1, "identity shortcut requires stride == 1"

    s1, b1 = _bn_fold(p["bn1_gamma"], p["bn1_beta"], p["bn1_mean"], p["bn1_var"])
    act = _bn_relu(x, s1, b1)

    # Shortcut: raw input if equal, else 1x1 strided conv of the activated input
    # (exactly the PyTorch code path where x is reassigned before convShortcut).
    shortcut = x if equal_in_out else conv2d_pallas(act, p["sc_w"], stride)

    # Conv1 (3x3, stride) -> BN2 + ReLU -> [dropout] -> Conv2 (3x3) + shortcut.
    h = conv2d_pallas(act, p["conv1_w"], stride)
    s2, b2 = _bn_fold(p["bn2_gamma"], p["bn2_beta"], p["bn2_mean"], p["bn2_var"])
    h = _bn_relu(h, s2, b2)
    # dropRate = 0.0 / eval-mode F.dropout is an identity; skipped.
    return conv2d_pallas(h, p["conv2_w"], 1, residual=shortcut)


def network_block_forward(x, layer_params, stride):
    for i, p in enumerate(layer_params):
        x = basic_block_forward(x, p, stride if i == 0 else 1)
    return x


# -------------------------- pure-XLA reference ------------------------------ #

def _conv_ref(act, w_hwio, stride, pad):
    return jax.lax.conv_general_dilated(
        act, w_hwio, window_strides=(stride, stride),
        padding=((pad, pad), (pad, pad)),
        dimension_numbers=("NHWC", "HWIO", "NHWC"))


def network_block_reference(x, layer_params, stride):
    for i, p in enumerate(layer_params):
        s = stride if i == 0 else 1
        in_p, out_p = x.shape[-1], p["conv1_w"].shape[-1]
        s1, b1 = _bn_fold(p["bn1_gamma"], p["bn1_beta"], p["bn1_mean"], p["bn1_var"])
        act = jnp.maximum(x * s1 + b1, 0.0)
        shortcut = x if in_p == out_p else _conv_ref(act, p["sc_w"], s, 0)
        h = _conv_ref(act, p["conv1_w"], s, 1)
        s2, b2 = _bn_fold(p["bn2_gamma"], p["bn2_beta"], p["bn2_mean"], p["bn2_var"])
        h = jnp.maximum(h * s2 + b2, 0.0)
        x = _conv_ref(h, p["conv2_w"], 1, 1) + shortcut
    return x


# ----------------------------------- main ----------------------------------- #

if __name__ == "__main__":
    nb_layers, in_planes, out_planes, stride = 2, 4, 8, 2

    key = jax.random.PRNGKey(0)
    kx, kp = jax.random.split(key)
    x_nchw = jax.random.normal(kx, (2, in_planes, 16, 16), jnp.float32)

    layer_keys = jax.random.split(kp, nb_layers)
    params = [
        init_basic_block_params(layer_keys[i],
                                in_planes if i == 0 else out_planes,
                                out_planes)
        for i in range(nb_layers)
    ]

    x_nhwc = jnp.transpose(x_nchw, (0, 2, 3, 1))
    fwd = jax.jit(network_block_forward, static_argnums=2)
    y_nhwc = fwd(x_nhwc, params, stride)
    y_nchw = jnp.transpose(y_nhwc, (0, 3, 1, 2))  # back to PyTorch NCHW convention
    jax.block_until_ready(y_nchw)

    assert y_nchw.shape == (2, out_planes, 8, 8)

    # Sanity check against a pure-XLA reference (loose tolerance: bf16 matmul path).
    y_ref = network_block_reference(x_nhwc, params, stride)
    err = float(jnp.max(jnp.abs(y_nhwc - y_ref)))
    assert err < 0.25, f"mismatch vs reference: max abs err {err}"

    print("KERNEL_OK")
</pallas_src>

<mosaic_0001>
module attributes {stable_mosaic.version = 11 : i64} {
  func.func @_conv_matmul_kernel(%arg0: i32, %arg1: memref<64x36xbf16, #tpu.memory_space<vmem>>, %arg2: memref<36x8xbf16, #tpu.memory_space<vmem>>, %arg3: memref<64x8xf32, #tpu.memory_space<vmem>>) attributes {dimension_semantics = [#tpu.dimension_semantics<parallel>], iteration_bounds = array<i64: 2>, scalar_prefetch = 0 : i64, scratch_operands = 0 : i64, tpu.core_type = #tpu.core_type<tc>, window_params = [{transform_indices = @transform_0, window_bounds = array<i64: 64, 36>}, {pipeline_mode = #tpu.pipeline_mode<synchronous>, transform_indices = @transform_1, window_bounds = array<i64: 36, 8>}, {transform_indices = @transform_2, window_bounds = array<i64: 64, 8>}]} {
    %c0 = arith.constant 0 : index
    %c0_0 = arith.constant 0 : index
    %0 = vector.load %arg1[%c0, %c0_0] : memref<64x36xbf16, #tpu.memory_space<vmem>>, vector<64x36xbf16>
    %c0_1 = arith.constant 0 : index
    %c0_2 = arith.constant 0 : index
    %1 = vector.load %arg2[%c0_1, %c0_2] : memref<36x8xbf16, #tpu.memory_space<vmem>>, vector<36x8xbf16>
    %cst = arith.constant dense<0.000000e+00> : vector<64x8xf32>
    %2 = tpu.matmul %0, %1, %cst {dimension_numbers = #tpu.dot_dimension_numbers<[1], [0], [0], [1], [0, 0, 1, 1], [], []>} : vector<64x36xbf16>, vector<36x8xbf16>, vector<64x8xf32> -> vector<64x8xf32>
    %c0_3 = arith.constant 0 : index
    %c0_4 = arith.constant 0 : index
    %3 = vector.load %arg3[%c0_3, %c0_4] : memref<64x8xf32, #tpu.memory_space<vmem>>, vector<64x8xf32>
    tpu.vector_store %arg3[%c0_3, %c0_4], %2 {strides = array<i32>} : memref<64x8xf32, #tpu.memory_space<vmem>>, vector<64x8xf32>,
    return
  }
  func.func @transform_0(%arg0: i32) -> (i32, i32) {
    %c0_i32 = arith.constant 0 : i32
    %c0_i32_0 = arith.constant 0 : i32
    return %arg0, %c0_i32 : i32, i32
  }
  func.func @transform_1(%arg0: i32) -> (i32, i32) {
    %c0_i32 = arith.constant 0 : i32
    %c0_i32_0 = arith.constant 0 : i32
    %c0_i32_1 = arith.constant 0 : i32
    return %c0_i32, %c0_i32_0 : i32, i32
  }
  func.func @transform_2(%arg0: i32) -> (i32, i32) {
    %c0_i32 = arith.constant 0 : i32
    %c0_i32_0 = arith.constant 0 : i32
    return %arg0, %c0_i32 : i32, i32
  }
}

module attributes {stable_mosaic.version = 11 : i64} {
  func.func @_conv_matmul_kernel(%arg0: i32, %arg1: memref<64x4xbf16, #tpu.memory_space<vmem>>, %arg2: memref<4x8xbf16, #tpu.memory_space<vmem>>, %arg3: memref<64x8xf32, #tpu.memory_space<vmem>>) attributes {dimension_semantics = [#tpu.dimension_semantics<parallel>], iteration_bounds = array<i64: 2>, scalar_prefetch = 0 : i64, scratch_operands = 0 : i64, tpu.core_type = #tpu.core_type<tc>, window_params = [{transform_indices = @transform_0, window_bounds = array<i64: 64, 4>}, {pipeline_mode = #tpu.pipeline_mode<synchronous>, transform_indices = @transform_1, window_bounds = array<i64: 4, 8>}, {transform_indices = @transform_2, window_bounds = array<i64: 64, 8>}]} {
    %c0 = arith.constant 0 : index
    %c0_0 = arith.constant 0 : index
    %0 = vector.load %arg1[%c0, %c0_0] : memref<64x4xbf16, #tpu.memory_space<vmem>>, vector<64x4xbf16>
    %c0_1 = arith.constant 0 : index
    %c0_2 = arith.constant 0 : index
    %1 = vector.load %arg2[%c0_1, %c0_2] : memref<4x8xbf16, #tpu.memory_space<vmem>>, vector<4x8xbf16>
    %cst = arith.constant dense<0.000000e+00> : vector<64x8xf32>
    %2 = tpu.matmul %0, %1, %cst {dimension_numbers = #tpu.dot_dimension_numbers<[1], [0], [0], [1], [0, 0, 1, 1], [], []>} : vector<64x4xbf16>, vector<4x8xbf16>, vector<64x8xf32> -> vector<64x8xf32>
    %c0_3 = arith.constant 0 : index
    %c0_4 = arith.constant 0 : index
    %3 = vector.load %arg3[%c0_3, %c0_4] : memref<64x8xf32, #tpu.memory_space<vmem>>, vector<64x8xf32>
    tpu.vector_store %arg3[%c0_3, %c0_4], %2 {strides = array<i32>} : memref<64x8xf32, #tpu.memory_space<vmem>>, vector<64x8xf32>,
    return
  }
  func.func @transform_0(%arg0: i32) -> (i32, i32) {
    %c0_i32 = arith.constant 0 : i32
    %c0_i32_0 = arith.constant 0 : i32
    return %arg0, %c0_i32 : i32, i32
  }
  func.func @transform_1(%arg0: i32) -> (i32, i32) {
    %c0_i32 = arith.constant 0 : i32
    %c0_i32_0 = arith.constant 0 : i32
    %c0_i32_1 = arith.constant 0 : i32
    return %c0_i32, %c0_i32_0 : i32, i32
  }
  func.func @transform_2(%arg0: i32) -> (i32, i32) {
    %c0_i32 = arith.constant 0 : i32
    %c0_i32_0 = arith.constant 0 : i32
    return %arg0, %c0_i32 : i32, i32
  }
}

module attributes {stable_mosaic.version = 11 : i64} {
  func.func @_conv_matmul_res_kernel(%arg0: i32, %arg1: memref<64x72xbf16, #tpu.memory_space<vmem>>, %arg2: memref<72x8xbf16, #tpu.memory_space<vmem>>, %arg3: memref<64x8xf32, #tpu.memory_space<vmem>>, %arg4: memref<64x8xf32, #tpu.memory_space<vmem>>) attributes {dimension_semantics = [#tpu.dimension_semantics<parallel>], iteration_bounds = array<i64: 2>, scalar_prefetch = 0 : i64, scratch_operands = 0 : i64, tpu.core_type = #tpu.core_type<tc>, window_params = [{transform_indices = @transform_0, window_bounds = array<i64: 64, 72>}, {pipeline_mode = #tpu.pipeline_mode<synchronous>, transform_indices = @transform_1, window_bounds = array<i64: 72, 8>}, {transform_indices = @transform_2, window_bounds = array<i64: 64, 8>}, {transform_indices = @transform_3, window_bounds = array<i64: 64, 8>}]} {
    %c0 = arith.constant 0 : index
    %c0_0 = arith.constant 0 : index
    %0 = vector.load %arg1[%c0, %c0_0] : memref<64x72xbf16, #tpu.memory_space<vmem>>, vector<64x72xbf16>
    %c0_1 = arith.constant 0 : index
    %c0_2 = arith.constant 0 : index
    %1 = vector.load %arg2[%c0_1, %c0_2] : memref<72x8xbf16, #tpu.memory_space<vmem>>, vector<72x8xbf16>
    %cst = arith.constant dense<0.000000e+00> : vector<64x8xf32>
    %2 = tpu.matmul %0, %1, %cst {dimension_numbers = #tpu.dot_dimension_numbers<[1], [0], [0], [1], [0, 0, 1, 1], [], []>} : vector<64x72xbf16>, vector<72x8xbf16>, vector<64x8xf32> -> vector<64x8xf32>
    %c0_3 = arith.constant 0 : index
    %c0_4 = arith.constant 0 : index
    %3 = vector.load %arg3[%c0_3, %c0_4] : memref<64x8xf32, #tpu.memory_space<vmem>>, vector<64x8xf32>
    %4 = arith.addf %2, %3 : vector<64x8xf32>
    %c0_5 = arith.constant 0 : index
    %c0_6 = arith.constant 0 : index
    %5 = vector.load %arg4[%c0_5, %c0_6] : memref<64x8xf32, #tpu.memory_space<vmem>>, vector<64x8xf32>
    tpu.vector_store %arg4[%c0_5, %c0_6], %4 {strides = array<i32>} : memref<64x8xf32, #tpu.memory_space<vmem>>, vector<64x8xf32>,
    return
  }
  func.func @transform_0(%arg0: i32) -> (i32, i32) {
    %c0_i32 = arith.constant 0 : i32
    %c0_i32_0 = arith.constant 0 : i32
    return %arg0, %c0_i32 : i32, i32
  }
  func.func @transform_1(%arg0: i32) -> (i32, i32) {
    %c0_i32 = arith.constant 0 : i32
    %c0_i32_0 = arith.constant 0 : i32
    %c0_i32_1 = arith.constant 0 : i32
    return %c0_i32, %c0_i32_0 : i32, i32
  }
  func.func @transform_2(%arg0: i32) -> (i32, i32) {
    %c0_i32 = arith.constant 0 : i32
    %c0_i32_0 = arith.constant 0 : i32
    return %arg0, %c0_i32 : i32, i32
  }
  func.func @transform_3(%arg0: i32) -> (i32, i32) {
    %c0_i32 = arith.constant 0 : i32
    %c0_i32_0 = arith.constant 0 : i32
    return %arg0, %c0_i32 : i32, i32
  }
}

module attributes {stable_mosaic.version = 11 : i64} {
  func.func @_conv_matmul_kernel(%arg0: i32, %arg1: memref<64x72xbf16, #tpu.memory_space<vmem>>, %arg2: memref<72x8xbf16, #tpu.memory_space<vmem>>, %arg3: memref<64x8xf32, #tpu.memory_space<vmem>>) attributes {dimension_semantics = [#tpu.dimension_semantics<parallel>], iteration_bounds = array<i64: 2>, scalar_prefetch = 0 : i64, scratch_operands = 0 : i64, tpu.core_type = #tpu.core_type<tc>, window_params = [{transform_indices = @transform_0, window_bounds = array<i64: 64, 72>}, {pipeline_mode = #tpu.pipeline_mode<synchronous>, transform_indices = @transform_1, window_bounds = array<i64: 72, 8>}, {transform_indices = @transform_2, window_bounds = array<i64: 64, 8>}]} {
    %c0 = arith.constant 0 : index
    %c0_0 = arith.constant 0 : index
    %0 = vector.load %arg1[%c0, %c0_0] : memref<64x72xbf16, #tpu.memory_space<vmem>>, vector<64x72xbf16>
    %c0_1 = arith.constant 0 : index
    %c0_2 = arith.constant 0 : index
    %1 = vector.load %arg2[%c0_1, %c0_2] : memref<72x8xbf16, #tpu.memory_space<vmem>>, vector<72x8xbf16>
    %cst = arith.constant dense<0.000000e+00> : vector<64x8xf32>
    %2 = tpu.matmul %0, %1, %cst {dimension_numbers = #tpu.dot_dimension_numbers<[1], [0], [0], [1], [0, 0, 1, 1], [], []>} : vector<64x72xbf16>, vector<72x8xbf16>, vector<64x8xf32> -> vector<64x8xf32>
    %c0_3 = arith.constant 0 : index
    %c0_4 = arith.constant 0 : index
    %3 = vector.load %arg3[%c0_3, %c0_4] : memref<64x8xf32, #tpu.memory_space<vmem>>, vector<64x8xf32>
    tpu.vector_store %arg3[%c0_3, %c0_4], %2 {strides = array<i32>} : memref<64x8xf32, #tpu.memory_space<vmem>>, vector<64x8xf32>,
    return
  }
  func.func @transform_0(%arg0: i32) -> (i32, i32) {
    %c0_i32 = arith.constant 0 : i32
    %c0_i32_0 = arith.constant 0 : i32
    return %arg0, %c0_i32 : i32, i32
  }
  func.func @transform_1(%arg0: i32) -> (i32, i32) {
    %c0_i32 = arith.constant 0 : i32
    %c0_i32_0 = arith.constant 0 : i32
    %c0_i32_1 = arith.constant 0 : i32
    return %c0_i32, %c0_i32_0 : i32, i32
  }
  func.func @transform_2(%arg0: i32) -> (i32, i32) {
    %c0_i32 = arith.constant 0 : i32
    %c0_i32_0 = arith.constant 0 : i32
    return %arg0, %c0_i32 : i32, i32
  }
}

module attributes {stable_mosaic.version = 11 : i64} {
  func.func @_conv_matmul_res_kernel(%arg0: i32, %arg1: memref<64x72xbf16, #tpu.memory_space<vmem>>, %arg2: memref<72x8xbf16, #tpu.memory_space<vmem>>, %arg3: memref<64x8xf32, #tpu.memory_space<vmem>>, %arg4: memref<64x8xf32, #tpu.memory_space<vmem>>) attributes {dimension_semantics = [#tpu.dimension_semantics<parallel>], iteration_bounds = array<i64: 2>, scalar_prefetch = 0 : i64, scratch_operands = 0 : i64, tpu.core_type = #tpu.core_type<tc>, window_params = [{transform_indices = @transform_0, window_bounds = array<i64: 64, 72>}, {pipeline_mode = #tpu.pipeline_mode<synchronous>, transform_indices = @transform_1, window_bounds = array<i64: 72, 8>}, {transform_indices = @transform_2, window_bounds = array<i64: 64, 8>}, {transform_indices = @transform_3, window_bounds = array<i64: 64, 8>}]} {
    %c0 = arith.constant 0 : index
    %c0_0 = arith.constant 0 : index
    %0 = vector.load %arg1[%c0, %c0_0] : memref<64x72xbf16, #tpu.memory_space<vmem>>, vector<64x72xbf16>
    %c0_1 = arith.constant 0 : index
    %c0_2 = arith.constant 0 : index
    %1 = vector.load %arg2[%c0_1, %c0_2] : memref<72x8xbf16, #tpu.memory_space<vmem>>, vector<72x8xbf16>
    %cst = arith.constant dense<0.000000e+00> : vector<64x8xf32>
    %2 = tpu.matmul %0, %1, %cst {dimension_numbers = #tpu.dot_dimension_numbers<[1], [0], [0], [1], [0, 0, 1, 1], [], []>} : vector<64x72xbf16>, vector<72x8xbf16>, vector<64x8xf32> -> vector<64x8xf32>
    %c0_3 = arith.constant 0 : index
    %c0_4 = arith.constant 0 : index
    %3 = vector.load %arg3[%c0_3, %c0_4] : memref<64x8xf32, #tpu.memory_space<vmem>>, vector<64x8xf32>
    %4 = arith.addf %2, %3 : vector<64x8xf32>
    %c0_5 = arith.constant 0 : index
    %c0_6 = arith.constant 0 : index
    %5 = vector.load %arg4[%c0_5, %c0_6] : memref<64x8xf32, #tpu.memory_space<vmem>>, vector<64x8xf32>
    tpu.vector_store %arg4[%c0_5, %c0_6], %4 {strides = array<i32>} : memref<64x8xf32, #tpu.memory_space<vmem>>, vector<64x8xf32>,
    return
  }
  func.func @transform_0(%arg0: i32) -> (i32, i32) {
    %c0_i32 = arith.constant 0 : i32
    %c0_i32_0 = arith.constant 0 : i32
    return %arg0, %c0_i32 : i32, i32
  }
  func.func @transform_1(%arg0: i32) -> (i32, i32) {
    %c0_i32 = arith.constant 0 : i32
    %c0_i32_0 = arith.constant 0 : i32
    %c0_i32_1 = arith.constant 0 : i32
    return %c0_i32, %c0_i32_0 : i32, i32
  }
  func.func @transform_2(%arg0: i32) -> (i32, i32) {
    %c0_i32 = arith.constant 0 : i32
    %c0_i32_0 = arith.constant 0 : i32
    return %arg0, %c0_i32 : i32, i32
  }
  func.func @transform_3(%arg0: i32) -> (i32, i32) {
    %c0_i32 = arith.constant 0 : i32
    %c0_i32_0 = arith.constant 0 : i32
    return %arg0, %c0_i32 : i32, i32
  }
}

</mosaic_0001>

<bundles_post_ra>
// kernel: network_block_forward.6
= control target key start
LH: loop header
LB: loop body
LE: loop exit
PB: predicated region body
PF: predicated region fallthrough
CT: control target
= control target key end

     0   :  { %s392_s9 = smov 0   ;;  %s430_s0 = inlined_call_operand.vmem [shape: bf16[128,36], index: 0, kind: input, shape index: {}]   ;;  %s431_s1 = inlined_call_operand.vmem [shape: bf16[36,8], index: 1, kind: input, shape index: {}]   ;;  %s432_s2 = inlined_call_operand.vmem [shape: f32[128,8], index: 2, kind: output, shape index: {}]  }
   0x1 LB: > { %s307_s10 = sadd.s32 4294967295, %s375_s9   ;;  %p311_p0 = scmp.ge.s32.totalorder %s375_s9, 1  ;;  %s375_s9 = sphi %s392_s9, %s12_s9  }
   0x2   : > { %p113_p1 = scmp.lt.s32.totalorder %s375_s9, 3 }
   0x4   : > { %p114_p2 = pnand %p311_p0, %p113_p1 }
   0x5   : > { %s312_s13 = sshll.u32 (!%p114_p2), %s307_s10, 3 }
   0x6   : > { %117 = sbr.rel (%p114_p2) target bundleno = 171 (0xab), region = 28  ;;  %p136_p3 = scmp.lt.s32.totalorder (!%p114_p2), %s312_s13, 15 }
   0xb   : > { %v160_v0 = vld [vmem:[%s431_s1 + $0x10] sm:$0x3]  ;;  %vm209_vm0 = vcmask 1041408   ;;  %s434_s13 = smov (!%p136_p3, %s312_s13), 15  ;;  %v351_v4 = vld [vmem:[%s431_s1 + $0x8] sm:$0xff]  ;;  %v350_v5 = vld [vmem:[%s431_s1] sm:$0xff] }
   0xc   : > { %v190_v1 = vunpack.c.l.b16 %v160_v0  ;;  %s313_s16 = sshll.u32 %s434_s13, 2  ;;  %vm196_vm1 = vcmask 293888   ;;  %s315_s22 = sshll.u32 %s434_s13, 3  ;;  %vm242_vm2 = vcmask 64512  }
   0xd   : > { %s139_s21 = scalar_lea.vmem %s430_s0, %s313_s16  ;;  %s145_s25 = scalar_lea.vmem %s432_s2, %s315_s22 }
   0xe   : > { %v193_v2 = vpack.c.b16 %v190_v1, %v190_v1  ;;  %v346_v6 = vld [vmem:[%s139_s21] sm:$0xff]  ;;  %v347_v7 = vld [vmem:[%s139_s21 + $0x8] sm:$0xff]  ;;  %v348_v8 = vld [vmem:[%s139_s21 + $0x10] sm:$0xff] }
   0xf   : > { %v349_v9 = vld [vmem:[%s139_s21 + $0x18] sm:$0xff] }
  0x10   : > { %v211_v3 = vsel %vm209_vm0, %v193_v2, 0 }
  0x11   : > { %218 = vmatpush.bf16.msra.mxu0 %v211_v3  ;;  %352 = vmatpush.bf16.msra.mxu1 %v211_v3 }
  0x12   : > { %353 = vmatpush.bf16.msra.mxu2 %v211_v3  ;;  %354 = vmatpush.bf16.msra.mxu3 %v211_v3 }
  0x15   : > { %219 = vmatpush.bf16.msra.mxu0 %v351_v4  ;;  %355 = vmatpush.bf16.msra.mxu1 %v351_v4 }
  0x16   : > { %356 = vmatpush.bf16.msra.mxu2 %v351_v4  ;;  %357 = vmatpush.bf16.msra.mxu3 %v351_v4 }
  0x19   : > { %220 = vmatpush.bf16.msra.mxu0 %v350_v5  ;;  %358 = vmatpush.bf16.msra.mxu1 %v350_v5 }
  0x1a   : > { %359 = vmatpush.bf16.msra.mxu2 %v350_v5  ;;  %360 = vmatpush.bf16.msra.mxu3 %v350_v5 }
  0x1c   : > { %340 = vmatmul.msk.bf16.vlgmr.msra.gmra.mxu0 %vm196_vm1, %v346_v6  ;;  %341 = vmatmul.msk.bf16.vlgmr.msra.gmra.mxu1 %vm196_vm1, %v347_v7 }
  0x1d   : > { %342 = vmatmul.msk.bf16.vlgmr.msra.gmra.mxu2 %vm196_vm1, %v348_v8  ;;  %343 = vmatmul.msk.bf16.vlgmr.msra.gmra.mxu3 %vm196_vm1, %v349_v9 }
  0x99   : > { %v222_v10 = vpop.f32.mrf.mxu0  ;;  %v227_v11 = vpop.f32.mrf.mxu1 }
  0x9a   : > { %243 = vst.msk [vmem:[%s145_s25] sm:$0xff] %vm242_vm2, %v222_v10 }
  0x9b   : > { %245 = vst.msk [vmem:[%s145_s25 + $0x10] sm:$0xff] %vm242_vm2, %v227_v11 }
  0xa0   : > { %v232_v12 = vpop.f32.mrf.mxu2  ;;  %v237_v13 = vpop.f32.mrf.mxu3 }
  0xa1   : > { %247 = vst.msk [vmem:[%s145_s25 + $0x20] sm:$0xff] %vm242_vm2, %v232_v12  ;;  %v224_v14 = vpop.f32.mrf.mxu0  ;;  %v229_v15 = vpop.f32.mrf.mxu1 }
  0xa2   : > { %249 = vst.msk [vmem:[%s145_s25 + $0x30] sm:$0xff] %vm242_vm2, %v237_v13 }
  0xa3   : > { %244 = vst.msk [vmem:[%s145_s25 + $0x8] sm:$0xff] %vm242_vm2, %v224_v14 }
  0xa4   : > { %246 = vst.msk [vmem:[%s145_s25 + $0x18] sm:$0xff] %vm242_vm2, %v229_v15 }
  0xa8   : > { %v234_v16 = vpop.f32.mrf.mxu2  ;;  %v239_v17 = vpop.f32.mrf.mxu3 }
  0xa9   : > { %248 = vst.msk [vmem:[%s145_s25 + $0x28] sm:$0xff] %vm242_vm2, %v234_v16 }
  0xaa   : > { %250 = vst.msk [vmem:[%s145_s25 + $0x38] sm:$0xff] %vm242_vm2, %v239_v17 }
  0xab PF: > { %s12_s9 = sadd.s32 1, %s375_s9  }
  0xac   : > { %p9_p4 = scmp.ge.s32.totalorder %s12_s9, 4  }
  0xae   :  { %11 = sbr.rel (!%p9_p4) target bundleno = 1 (0x1), region = 58 }

// kernel: network_block_forward.5
= control target key start
LH: loop header
LB: loop body
LE: loop exit
PB: predicated region body
PF: predicated region fallthrough
CT: control target
= control target key end

     0   :  { %s357_s9 = smov 0   ;;  %s385_s0 = inlined_call_operand.vmem [shape: bf16[128,4], index: 0, kind: input, shape index: {}]   ;;  %s386_s1 = inlined_call_operand.vmem [shape: bf16[4,8], index: 1, kind: input, shape index: {}]   ;;  %s387_s2 = inlined_call_operand.vmem [shape: f32[128,8], index: 2, kind: output, shape index: {}]  }
   0x1 LB: > { %s288_s10 = sadd.s32 4294967295, %s340_s9   ;;  %p292_p0 = scmp.ge.s32.totalorder %s340_s9, 1  ;;  %s340_s9 = sphi %s357_s9, %s12_s9  }
   0x2   : > { %p113_p1 = scmp.lt.s32.totalorder %s340_s9, 3 }
   0x4   : > { %p114_p2 = pnand %p292_p0, %p113_p1 }
   0x5   : > { %s293_s13 = sshll.u32 (!%p114_p2), %s288_s10, 3 }
   0x6   : > { %117 = sbr.rel (%p114_p2) target bundleno = 159 (0x9f), region = 28  ;;  %p136_p3 = scmp.lt.s32.totalorder (!%p114_p2), %s293_s13, 15 }
   0xb   : > { %v156_v0 = vld [vmem:[%s386_s1] sm:$0x3]  ;;  %vm190_vm0 = vcmask 1041408   ;;  %s389_s13 = smov (!%p136_p3, %s293_s13), 15  ;;  %vm177_vm1 = vcmask 31744   ;;  %vm223_vm2 = vcmask 64512  }
   0xc   : > { %v192_v1 = vsel %vm190_vm0, %v156_v0, 0  ;;  %s294_s14 = sshll.u32 %s389_s13, 2  ;;  %s296_s18 = sshll.u32 %s389_s13, 3 }
   0xd   : > { %201 = vmatpush.bf16.msra.mxu0 %v192_v1  ;;  %323 = vmatpush.bf16.msra.mxu1 %v192_v1  ;;  %s139_s17 = scalar_lea.vmem %s385_s0, %s294_s14  ;;  %s145_s21 = scalar_lea.vmem %s387_s2, %s296_s18 }
   0xe   : > { %324 = vmatpush.bf16.msra.mxu2 %v192_v1  ;;  %325 = vmatpush.bf16.msra.mxu3 %v192_v1  ;;  %v319_v2 = vld [vmem:[%s139_s17] sm:$0xff]  ;;  %v320_v3 = vld [vmem:[%s139_s17 + $0x8] sm:$0xff]  ;;  %v321_v4 = vld [vmem:[%s139_s17 + $0x10] sm:$0xff] }
   0xf   : > { %v322_v5 = vld [vmem:[%s139_s17 + $0x18] sm:$0xff] }
  0x10   : > { %313 = vmatmul.msk.bf16.vlgmr.msra.gmra.mxu0 %vm177_vm1, %v319_v2  ;;  %314 = vmatmul.msk.bf16.vlgmr.msra.gmra.mxu1 %vm177_vm1, %v320_v3 }
  0x11   : > { %315 = vmatmul.msk.bf16.vlgmr.msra.gmra.mxu2 %vm177_vm1, %v321_v4  ;;  %316 = vmatmul.msk.bf16.vlgmr.msra.gmra.mxu3 %vm177_vm1, %v322_v5 }
  0x8d   : > { %v203_v6 = vpop.f32.mrf.mxu0  ;;  %v208_v7 = vpop.f32.mrf.mxu1 }
  0x8e   : > { %224 = vst.msk [vmem:[%s145_s21] sm:$0xff] %vm223_vm2, %v203_v6 }
  0x8f   : > { %226 = vst.msk [vmem:[%s145_s21 + $0x10] sm:$0xff] %vm223_vm2, %v208_v7 }
  0x94   : > { %v213_v8 = vpop.f32.mrf.mxu2  ;;  %v218_v9 = vpop.f32.mrf.mxu3 }
  0x95   : > { %228 = vst.msk [vmem:[%s145_s21 + $0x20] sm:$0xff] %vm223_vm2, %v213_v8  ;;  %v205_v10 = vpop.f32.mrf.mxu0  ;;  %v210_v11 = vpop.f32.mrf.mxu1 }
  0x96   : > { %230 = vst.msk [vmem:[%s145_s21 + $0x30] sm:$0xff] %vm223_vm2, %v218_v9 }
  0x97   : > { %225 = vst.msk [vmem:[%s145_s21 + $0x8] sm:$0xff] %vm223_vm2, %v205_v10 }
  0x98   : > { %227 = vst.msk [vmem:[%s145_s21 + $0x18] sm:$0xff] %vm223_vm2, %v210_v11 }
  0x9c   : > { %v215_v12 = vpop.f32.mrf.mxu2  ;;  %v220_v13 = vpop.f32.mrf.mxu3 }
  0x9d   : > { %229 = vst.msk [vmem:[%s145_s21 + $0x28] sm:$0xff] %vm223_vm2, %v215_v12 }
  0x9e   : > { %231 = vst.msk [vmem:[%s145_s21 + $0x38] sm:$0xff] %vm223_vm2, %v220_v13 }
  0x9f PF: > { %s12_s9 = sadd.s32 1, %s340_s9  }
  0xa0   : > { %p9_p4 = scmp.ge.s32.totalorder %s12_s9, 4  }
  0xa2   :  { %11 = sbr.rel (!%p9_p4) target bundleno = 1 (0x1), region = 58 }

// kernel: network_block_forward.8
= control target key start
LH: loop header
LB: loop body
LE: loop exit
PB: predicated region body
PF: predicated region fallthrough
CT: control target
= control target key end

     0   :  { %s424_s9 = smov 0   ;;  %s464_s0 = inlined_call_operand.vmem [shape: bf16[128,72], index: 0, kind: input, shape index: {}]   ;;  %s465_s1 = inlined_call_operand.vmem [shape: bf16[72,8], index: 1, kind: input, shape index: {}]   ;;  %s466_s2 = inlined_call_operand.vmem [shape: f32[128,8], index: 2, kind: output, shape index: {}]  }
   0x1 LB: > { %s323_s10 = sadd.s32 4294967295, %s407_s9   ;;  %p327_p0 = scmp.ge.s32.totalorder %s407_s9, 1  ;;  %s407_s9 = sphi %s424_s9, %s12_s9  }
   0x2   : > { %p113_p1 = scmp.lt.s32.totalorder %s407_s9, 3 }
   0x4   : > { %p114_p2 = pnand %p327_p0, %p113_p1 }
   0x5   : > { %s328_s13 = sshll.u32 (!%p114_p2), %s323_s10, 3 }
   0x6   : > { %117 = sbr.rel (%p114_p2) target bundleno = 179 (0xb3), region = 28  ;;  %p136_p3 = scmp.lt.s32.totalorder (!%p114_p2), %s328_s13, 15 }
   0xb   : > { %v164_v0 = vld [vmem:[%s465_s1 + $0x20] sm:$0xf]  ;;  %vm225_vm0 = vcmask 1043456   ;;  %v377_v4 = vld [vmem:[%s465_s1 + $0x18] sm:$0xff]  ;;  %v376_v5 = vld [vmem:[%s465_s1 + $0x10] sm:$0xff]  ;;  %s468_s13 = smov (!%p136_p3, %s328_s13), 15 }
   0xc   : > { %v202_v1 = vunpack.c.l.b16 %v164_v0  ;;  %v375_v6 = vld [vmem:[%s465_s1 + $0x8] sm:$0xff]  ;;  %s329_s20 = sshll.u32 %s468_s13, 2  ;;  %v374_v7 = vld [vmem:[%s465_s1] sm:$0xff]  ;;  %vm212_vm1 = vcmask 588800   ;;  %s331_s26 = sshll.u32 %s468_s13, 3  ;;  %vm258_vm2 = vcmask 64512  }
   0xd   : > { %s139_s25 = scalar_lea.vmem %s464_s0, %s329_s20  ;;  %s145_s29 = scalar_lea.vmem %s466_s2, %s331_s26 }
   0xe   : > { %v207_v2 = vpack.c.b16 %v202_v1, %v202_v1  ;;  %v370_v8 = vld [vmem:[%s139_s25] sm:$0xff]  ;;  %v371_v9 = vld [vmem:[%s139_s25 + $0x8] sm:$0xff]  ;;  %v372_v10 = vld [vmem:[%s139_s25 + $0x10] sm:$0xff] }
   0xf   : > { %v373_v11 = vld [vmem:[%s139_s25 + $0x18] sm:$0xff] }
  0x10   : > { %v227_v3 = vsel %vm225_vm0, %v207_v2, 0 }
  0x11   : > { %232 = vmatpush.bf16.msra.mxu0 %v227_v3  ;;  %378 = vmatpush.bf16.msra.mxu1 %v227_v3 }
  0x12   : > { %379 = vmatpush.bf16.msra.mxu2 %v227_v3  ;;  %380 = vmatpush.bf16.msra.mxu3 %v227_v3 }
  0x15   : > { %233 = vmatpush.bf16.msra.mxu0 %v377_v4  ;;  %381 = vmatpush.bf16.msra.mxu1 %v377_v4 }
  0x16   : > { %382 = vmatpush.bf16.msra.mxu2 %v377_v4  ;;  %383 = vmatpush.bf16.msra.mxu3 %v377_v4 }
  0x19   : > { %234 = vmatpush.bf16.msra.mxu0 %v376_v5  ;;  %384 = vmatpush.bf16.msra.mxu1 %v376_v5 }
  0x1a   : > { %385 = vmatpush.bf16.msra.mxu2 %v376_v5  ;;  %386 = vmatpush.bf16.msra.mxu3 %v376_v5 }
  0x1d   : > { %235 = vmatpush.bf16.msra.mxu0 %v375_v6  ;;  %387 = vmatpush.bf16.msra.mxu1 %v375_v6 }
  0x1e   : > { %388 = vmatpush.bf16.msra.mxu2 %v375_v6  ;;  %389 = vmatpush.bf16.msra.mxu3 %v375_v6 }
  0x21   : > { %236 = vmatpush.bf16.msra.mxu0 %v374_v7  ;;  %390 = vmatpush.bf16.msra.mxu1 %v374_v7 }
  0x22   : > { %391 = vmatpush.bf16.msra.mxu2 %v374_v7  ;;  %392 = vmatpush.bf16.msra.mxu3 %v374_v7 }
  0x24   : > { %364 = vmatmul.msk.bf16.vlgmr.msra.gmra.mxu0 %vm212_vm1, %v370_v8  ;;  %365 = vmatmul.msk.bf16.vlgmr.msra.gmra.mxu1 %vm212_vm1, %v371_v9 }
  0x25   : > { %366 = vmatmul.msk.bf16.vlgmr.msra.gmra.mxu2 %vm212_vm1, %v372_v10  ;;  %367 = vmatmul.msk.bf16.vlgmr.msra.gmra.mxu3 %vm212_vm1, %v373_v11 }
  0xa1   : > { %v238_v12 = vpop.f32.mrf.mxu0  ;;  %v243_v13 = vpop.f32.mrf.mxu1 }
  0xa2   : > { %259 = vst.msk [vmem:[%s145_s29] sm:$0xff] %vm258_vm2, %v238_v12 }
  0xa3   : > { %261 = vst.msk [vmem:[%s145_s29 + $0x10] sm:$0xff] %vm258_vm2, %v243_v13 }
  0xa8   : > { %v248_v14 = vpop.f32.mrf.mxu2  ;;  %v253_v15 = vpop.f32.mrf.mxu3 }
  0xa9   : > { %263 = vst.msk [vmem:[%s145_s29 + $0x20] sm:$0xff] %vm258_vm2, %v248_v14  ;;  %v240_v16 = vpop.f32.mrf.mxu0  ;;  %v245_v17 = vpop.f32.mrf.mxu1 }
  0xaa   : > { %265 = vst.msk [vmem:[%s145_s29 + $0x30] sm:$0xff] %vm258_vm2, %v253_v15 }
  0xab   : > { %260 = vst.msk [vmem:[%s145_s29 + $0x8] sm:$0xff] %vm258_vm2, %v240_v16 }
  0xac   : > { %262 = vst.msk [vmem:[%s145_s29 + $0x18] sm:$0xff] %vm258_vm2, %v245_v17 }
  0xb0   : > { %v250_v18 = vpop.f32.mrf.mxu2  ;;  %v255_v19 = vpop.f32.mrf.mxu3 }
  0xb1   : > { %264 = vst.msk [vmem:[%s145_s29 + $0x28] sm:$0xff] %vm258_vm2, %v250_v18 }
  0xb2   : > { %266 = vst.msk [vmem:[%s145_s29 + $0x38] sm:$0xff] %vm258_vm2, %v255_v19 }
  0xb3 PF: > { %s12_s9 = sadd.s32 1, %s407_s9  }
  0xb4   : > { %p9_p4 = scmp.ge.s32.totalorder %s12_s9, 4  }
  0xb6   :  { %11 = sbr.rel (!%p9_p4) target bundleno = 1 (0x1), region = 58 }

// kernel: network_block_forward.7
= control target key start
LH: loop header
LB: loop body
LE: loop exit
PB: predicated region body
PF: predicated region fallthrough
CT: control target
= control target key end

     0   :  { %s500_s12 = smov 0   ;;  %s557_s0 = inlined_call_operand.vmem [shape: bf16[128,72], index: 0, kind: input, shape index: {}]   ;;  %s558_s1 = inlined_call_operand.vmem [shape: bf16[72,8], index: 1, kind: input, shape index: {}]   ;;  %s559_s2 = inlined_call_operand.vmem [shape: f32[128,8], index: 2, kind: input, shape index: {}]   ;;  %s560_s3 = inlined_call_operand.vmem [shape: f32[128,8], index: 3, kind: output, shape index: {}]  }
   0x1 LB: > { %s392_s13 = sadd.s32 4294967295, %s478_s12   ;;  %p396_p0 = scmp.ge.s32.totalorder %s478_s12, 1  ;;  %s478_s12 = sphi %s500_s12, %s13_s12  }
   0x2   : > { %p149_p1 = scmp.lt.s32.totalorder %s478_s12, 3 }
   0x4   : > { %p150_p2 = pnand %p396_p0, %p149_p1 }
   0x5   : > { %s397_s16 = sshll.u32 (!%p150_p2), %s392_s13, 3 }
   0x6   : > { %153 = sbr.rel (%p150_p2) target bundleno = 181 (0xb5), region = 32  ;;  %p179_p3 = scmp.lt.s32.totalorder (!%p150_p2), %s397_s16, 15 }
   0xb   : > { %v213_v0 = vld [vmem:[%s558_s1 + $0x20] sm:$0xf]  ;;  %vm282_vm0 = vcmask 1043456   ;;  %v448_v4 = vld [vmem:[%s558_s1 + $0x18] sm:$0xff]  ;;  %v447_v5 = vld [vmem:[%s558_s1 + $0x10] sm:$0xff]  ;;  %s562_s16 = smov (!%p179_p3, %s397_s16), 15 }
   0xc   : > { %v259_v1 = vunpack.c.l.b16 %v213_v0  ;;  %v446_v6 = vld [vmem:[%s558_s1 + $0x8] sm:$0xff]  ;;  %s398_s23 = sshll.u32 %s562_s16, 2  ;;  %v445_v7 = vld [vmem:[%s558_s1] sm:$0xff]  ;;  %vm269_vm1 = vcmask 588800   ;;  %s400_s29 = sshll.u32 %s562_s16, 3  ;;  %vm315_vm2 = vcmask 64512  }
   0xd   : > { %s182_s28 = scalar_lea.vmem %s557_s0, %s398_s23  ;;  %s188_s5 = scalar_lea.vmem %s559_s2, %s400_s29 }
   0xe   : > { %v264_v2 = vpack.c.b16 %v259_v1, %v259_v1  ;;  %v441_v8 = vld [vmem:[%s182_s28] sm:$0xff]  ;;  %v442_v9 = vld [vmem:[%s182_s28 + $0x8] sm:$0xff]  ;;  %v443_v10 = vld [vmem:[%s182_s28 + $0x10] sm:$0xff]  ;;  %s536_s8 = scalar_lea.vmem %s560_s3, %s400_s29 }
   0xf   : > { %v444_v11 = vld [vmem:[%s182_s28 + $0x18] sm:$0xff]  ;;  %v214_v12 = vld [vmem:[%s188_s5] sm:$0xff]  ;;  %v216_v13 = vld [vmem:[%s188_s5 + $0x10] sm:$0xff] }
  0x10   : > { %v284_v3 = vsel %vm282_vm0, %v264_v2, 0  ;;  %v218_v18 = vld [vmem:[%s188_s5 + $0x20] sm:$0xff]  ;;  %v220_v19 = vld [vmem:[%s188_s5 + $0x30] sm:$0xff]  ;;  %v215_v20 = vld [vmem:[%s188_s5 + $0x8] sm:$0xff] }
  0x11   : > { %289 = vmatpush.bf16.msra.mxu0 %v284_v3  ;;  %449 = vmatpush.bf16.msra.mxu1 %v284_v3  ;;  %v217_v21 = vld [vmem:[%s188_s5 + $0x18] sm:$0xff]  ;;  %v219_v30 = vld [vmem:[%s188_s5 + $0x28] sm:$0xff] }
  0x12   : > { %450 = vmatpush.bf16.msra.mxu2 %v284_v3  ;;  %451 = vmatpush.bf16.msra.mxu3 %v284_v3  ;;  %v221_v31 = vld [vmem:[%s188_s5 + $0x38] sm:$0xff] }
  0x15   : > { %290 = vmatpush.bf16.msra.mxu0 %v448_v4  ;;  %452 = vmatpush.bf16.msra.mxu1 %v448_v4 }
  0x16   : > { %453 = vmatpush.bf16.msra.mxu2 %v448_v4  ;;  %454 = vmatpush.bf16.msra.mxu3 %v448_v4 }
  0x19   : > { %291 = vmatpush.bf16.msra.mxu0 %v447_v5  ;;  %455 = vmatpush.bf16.msra.mxu1 %v447_v5 }
  0x1a   : > { %456 = vmatpush.bf16.msra.mxu2 %v447_v5  ;;  %457 = vmatpush.bf16.msra.mxu3 %v447_v5 }
  0x1d   : > { %292 = vmatpush.bf16.msra.mxu0 %v446_v6  ;;  %458 = vmatpush.bf16.msra.mxu1 %v446_v6 }
  0x1e   : > { %459 = vmatpush.bf16.msra.mxu2 %v446_v6  ;;  %460 = vmatpush.bf16.msra.mxu3 %v446_v6 }
  0x21   : > { %293 = vmatpush.bf16.msra.mxu0 %v445_v7  ;;  %461 = vmatpush.bf16.msra.mxu1 %v445_v7 }
  0x22   : > { %462 = vmatpush.bf16.msra.mxu2 %v445_v7  ;;  %463 = vmatpush.bf16.msra.mxu3 %v445_v7 }
  0x24   : > { %435 = vmatmul.msk.bf16.vlgmr.msra.gmra.mxu0 %vm269_vm1, %v441_v8  ;;  %436 = vmatmul.msk.bf16.vlgmr.msra.gmra.mxu1 %vm269_vm1, %v442_v9 }
  0x25   : > { %437 = vmatmul.msk.bf16.vlgmr.msra.gmra.mxu2 %vm269_vm1, %v443_v10  ;;  %438 = vmatmul.msk.bf16.vlgmr.msra.gmra.mxu3 %vm269_vm1, %v444_v11 }
  0xa1   : > { %v295_v14 = vpop.f32.mrf.mxu0  ;;  %v300_v15 = vpop.f32.mrf.mxu1 }
  0xa2   : > { %v296_v16 = vadd.f32 %v295_v14, %v214_v12  ;;  %v301_v17 = vadd.f32 %v300_v15, %v216_v13 }
  0xa4   : > { %316 = vst.msk [vmem:[%s536_s8] sm:$0xff] %vm315_vm2, %v296_v16 }
  0xa5   : > { %318 = vst.msk [vmem:[%s536_s8 + $0x10] sm:$0xff] %vm315_vm2, %v301_v17 }
  0xa8   : > { %v305_v22 = vpop.f32.mrf.mxu2  ;;  %v310_v23 = vpop.f32.mrf.mxu3 }
  0xa9   : > { %v306_v24 = vadd.f32 %v305_v22, %v218_v18  ;;  %v311_v25 = vadd.f32 %v310_v23, %v220_v19  ;;  %v297_v26 = vpop.f32.mrf.mxu0  ;;  %v302_v27 = vpop.f32.mrf.mxu1 }
  0xaa   : > { %v298_v28 = vadd.f32 %v297_v26, %v215_v20  ;;  %v303_v29 = vadd.f32 %v302_v27, %v217_v21 }
  0xab   : > { %320 = vst.msk [vmem:[%s536_s8 + $0x20] sm:$0xff] %vm315_vm2, %v306_v24 }
  0xac   : > { %322 = vst.msk [vmem:[%s536_s8 + $0x30] sm:$0xff] %vm315_vm2, %v311_v25 }
  0xad   : > { %317 = vst.msk [vmem:[%s536_s8 + $0x8] sm:$0xff] %vm315_vm2, %v298_v28 }
  0xae   : > { %319 = vst.msk [vmem:[%s536_s8 + $0x18] sm:$0xff] %vm315_vm2, %v303_v29 }
  0xb0   : > { %v307_v32 = vpop.f32.mrf.mxu2  ;;  %v312_v33 = vpop.f32.mrf.mxu3 }
  0xb1   : > { %v308_v34 = vadd.f32 %v307_v32, %v219_v30  ;;  %v313_v35 = vadd.f32 %v312_v33, %v221_v31 }
  0xb3   : > { %321 = vst.msk [vmem:[%s536_s8 + $0x28] sm:$0xff] %vm315_vm2, %v308_v34 }
  0xb4   : > { %323 = vst.msk [vmem:[%s536_s8 + $0x38] sm:$0xff] %vm315_vm2, %v313_v35 }
  0xb5 PF: > { %s13_s12 = sadd.s32 1, %s478_s12  }
  0xb6   : > { %p10_p4 = scmp.ge.s32.totalorder %s13_s12, 4  }
  0xb8   :  { %12 = sbr.rel (!%p10_p4) target bundleno = 1 (0x1), region = 65 }

// kernel: network_block_forward.9
= control target key start
LH: loop header
LB: loop body
LE: loop exit
PB: predicated region body
PF: predicated region fallthrough
CT: control target
= control target key end

     0   :  { %8 = vsyncpa [#allocation3], 0  ;;  %s752_s0 = inlined_call_operand.vmem [shape: bf16[128,72], index: 0, kind: input, shape index: {}]   ;;  %s753_s1 = inlined_call_operand.vmem [shape: bf16[72,8], index: 1, kind: input, shape index: {}]   ;;  %s754_s2 = inlined_call_operand.vmem [shape: f32[128,8], index: 2, kind: input, shape index: {}]   ;;  %s755_s3 = inlined_call_operand.hbm [shape: f32[128,8], index: 3, kind: output, shape index: {}]  }
   0x1   :  { %10 = vsyncpa [#allocation3 + $0x1], 0  ;;  %s613_s12 = smov 0   ;;  %s615_s13 = smov 0  }
   0x2   :  { %s617_s14 = smov 0   ;;  %s619_s15 = smov 0  }
   0x3 LB: > { %s634_s16 = sadd.s32 4294967295, %s589_s15   ;;  %s412_s17 = sadd.s32 4294967294, %s589_s15   ;;  %s589_s15 = sphi %s619_s15, %s761_s15   ;;  %s585_s14 = sphi %s617_s14, %s760_s14   ;;  %s581_s13 = sphi %s615_s13, %s759_s13   ;;  %s577_s12 = sphi %s613_s12, %s758_s12  }
   0x4   : > { %s638_s18 = sadd.s32 1, %s589_s15   ;;  %s96_s19 = sadd.s32 1, %s585_s14 }
   0x5   : > { %s93_s20 = ssub.s32 %s589_s15, %s638_s18  ;;  %p106_p0 = scmp.ne.s32.totalorder %s585_s14, %s581_s13 }
   0x6   : > { %p94_p1 = scmp.eq.s32.totalorder %s93_s20, 0  ;;  %p107_p2 = scmp.eq.s32.totalorder %s634_s16, 1 }
   0x7   : > { %p112_p3 = scmp.ne.s32.totalorder %s581_s13, %s577_s12  ;;  %p113_p4 = scmp.eq.s32.totalorder %s412_s17, 1 }
   0x8   : > { %s649_s21 = scalar_select %p94_p1, %s585_s14, %s96_s19  }
   0x9   : > { %p651_p5 = por %p107_p2, %p106_p0  ;;  %p655_p6 = por %p113_p4, %p112_p3 }
   0xa   : > { %p415_p7 = scmp.ge.s32.totalorder %s589_s15, 1  ;;  %p152_p8 = scmp.lt.s32.totalorder %s589_s15, 3 }
   0xc   : > { %p153_p9 = pnand %p415_p7, %p152_p8 }
   0xd   : > { %s417_s26 = sshll.u32 (!%p153_p9), %s634_s16, 3  ;;  %s178_s19 = sand.u32 (!%p153_p9), 1, %s581_s13  }
   0xe   : > { %156 = sbr.rel (%p153_p9) target bundleno = 192 (0xc0), region = 32  ;;  %p182_p10 = scmp.lt.s32.totalorder (!%p153_p9), %s417_s26, 15 }
   0xf   : > { %s416_s27 = sshll.u32 (!%p153_p9), %s178_s19, 6  ;;  %s470_s28 = sshll.u32 (!%p153_p9), %s634_s16, 6 }
  0x10   : > { %s334_s4 = scalar_lea.hbm (!%p153_p9), %s755_s3, %s470_s28 }
  0x11   : > { %s337_s5 = sshll.u32 (!%p153_p9), %s334_s4, 4  ;;  %s338_s5 = int_to_ptr.hbm [resolvable:$true] %s337_s5 }
  0x12   : > { %s541_s7 = sshra.s32 (!%p153_p9), %s338_s5, 4  ;;  %s542_s7 = int_to_ptr.hbm [resolvable:$true] %s541_s7 }
  0x13   : > { %v211_v0 = vld [vmem:[%s753_s1 + $0x20] sm:$0xf]  ;;  %vm280_vm0 = vcmask 1043456   ;;  %v469_v4 = vld [vmem:[%s753_s1 + $0x18] sm:$0xff]  ;;  %v468_v5 = vld [vmem:[%s753_s1 + $0x10] sm:$0xff]  ;;  %s763_s26 = smov (!%p182_p10, %s417_s26), 15  ;;  %p548_p0 = scmp.lt.s32.totalorder %s542_s7, %s755_s3 }
  0x14   : > { %v257_v1 = vunpack.c.l.b16 %v211_v0  ;;  %v467_v6 = vld [vmem:[%s753_s1 + $0x8] sm:$0xff]  ;;  %s418_s6 = sshll.u32 %s763_s26, 2  ;;  %v466_v7 = vld [vmem:[%s753_s1] sm:$0xff]  ;;  %vm267_vm1 = vcmask 588800   ;;  %s420_s17 = sshll.u32 %s763_s26, 3  ;;  %vm313_vm2 = vcmask 64512  }
  0x15   : > { %s185_s11 = scalar_lea.vmem %s752_s0, %s418_s6  ;;  %s688_s25 = scalar_lea.vmem %s754_s2, %s420_s17 }
  0x16   : > { %v262_v2 = vpack.c.b16 %v257_v1, %v257_v1  ;;  %v462_v8 = vld [vmem:[%s185_s11] sm:$0xff]  ;;  %v463_v9 = vld [vmem:[%s185_s11 + $0x8] sm:$0xff]  ;;  %v464_v10 = vld [vmem:[%s185_s11 + $0x10] sm:$0xff]  ;;  %s694_s26 = scalar_lea.vmem [#allocation2], %s416_s27  ;;  %s323_s6 = scalar_lea.sflag [#allocation3], %s178_s19 }
  0x17   : > { %v465_v11 = vld [vmem:[%s185_s11 + $0x18] sm:$0xff]  ;;  %v212_v12 = vld [vmem:[%s688_s25] sm:$0xff]  ;;  %v214_v13 = vld [vmem:[%s688_s25 + $0x10] sm:$0xff]  ;;  %s335_s16 = sshll.u32 %s694_s26, 4  ;;  %s543_s8 = scalar_lea.hbm %s542_s7, 64  ;;  %s336_s16 = int_to_ptr.vmem [resolvable:$true] %s335_s16 }
  0x18   : > { %v282_v3 = vsel %vm280_vm0, %v262_v2, 0  ;;  %v216_v18 = vld [vmem:[%s688_s25 + $0x20] sm:$0xff]  ;;  %v218_v19 = vld [vmem:[%s688_s25 + $0x30] sm:$0xff]  ;;  %v213_v20 = vld [vmem:[%s688_s25 + $0x8] sm:$0xff]  ;;  %p544_p11 = scmp.ne.s32.totalorder %s542_s7, %s543_s8  ;;  %s547_s11 = scalar_lea.hbm %s755_s3, 128 }
  0x19   : > { %287 = vmatpush.bf16.msra.mxu0 %v282_v3  ;;  %471 = vmatpush.bf16.msra.mxu1 %v282_v3  ;;  %v215_v21 = vld [vmem:[%s688_s25 + $0x18] sm:$0xff]  ;;  %v217_v30 = vld [vmem:[%s688_s25 + $0x28] sm:$0xff]  ;;  %p549_p1 = scmp.lt.s32.totalorder %s547_s11, %s543_s8 }
  0x1a   : > { %472 = vmatpush.bf16.msra.mxu2 %v282_v3  ;;  %473 = vmatpush.bf16.msra.mxu3 %v282_v3  ;;  %v219_v31 = vld [vmem:[%s688_s25 + $0x38] sm:$0xff]  ;;  %p545_p12 = pnand %p544_p11, %p651_p5 }
  0x1b   : > { %p550_p2 = por %p549_p1, %p548_p0 }
  0x1c   : > { %p546_p13 = pneg %p545_p12 }
  0x1d   : > { %288 = vmatpush.bf16.msra.mxu0 %v469_v4  ;;  %474 = vmatpush.bf16.msra.mxu1 %v469_v4 }
  0x1e   : > { %475 = vmatpush.bf16.msra.mxu2 %v469_v4  ;;  %476 = vmatpush.bf16.msra.mxu3 %v469_v4  ;;  %p551_p3 = pnand %p550_p2, %p546_p13 }
  0x21   : > { %289 = vmatpush.bf16.msra.mxu0 %v468_v5  ;;  %477 = vmatpush.bf16.msra.mxu1 %v468_v5 }
  0x22   : > { %478 = vmatpush.bf16.msra.mxu2 %v468_v5  ;;  %479 = vmatpush.bf16.msra.mxu3 %v468_v5 }
  0x25   : > { %290 = vmatpush.bf16.msra.mxu0 %v467_v6  ;;  %480 = vmatpush.bf16.msra.mxu1 %v467_v6 }
  0x26   : > { %481 = vmatpush.bf16.msra.mxu2 %v467_v6  ;;  %482 = vmatpush.bf16.msra.mxu3 %v467_v6 }
  0x29   : > { %291 = vmatpush.bf16.msra.mxu0 %v466_v7  ;;  %483 = vmatpush.bf16.msra.mxu1 %v466_v7 }
  0x2a   : > { %484 = vmatpush.bf16.msra.mxu2 %v466_v7  ;;  %485 = vmatpush.bf16.msra.mxu3 %v466_v7 }
  0x2c   : > { %453 = vmatmul.msk.bf16.vlgmr.msra.gmra.mxu0 %vm267_vm1, %v462_v8  ;;  %454 = vmatmul.msk.bf16.vlgmr.msra.gmra.mxu1 %vm267_vm1, %v463_v9 }
  0x2d   : > { %455 = vmatmul.msk.bf16.vlgmr.msra.gmra.mxu2 %vm267_vm1, %v464_v10  ;;  %456 = vmatmul.msk.bf16.vlgmr.msra.gmra.mxu3 %vm267_vm1, %v465_v11 }
  0xa9   : > { %v293_v14 = vpop.f32.mrf.mxu0  ;;  %v298_v15 = vpop.f32.mrf.mxu1 }
  0xaa   : > { %v294_v16 = vadd.f32 %v293_v14, %v212_v12  ;;  %v299_v17 = vadd.f32 %v298_v15, %v214_v13 }
  0xac   : > { %314 = vst.msk [vmem:[%s694_s26] sm:$0xff] %vm313_vm2, %v294_v16 }
  0xad   : > { %316 = vst.msk [vmem:[%s694_s26 + $0x10] sm:$0xff] %vm313_vm2, %v299_v17 }
  0xb0   : > { %v303_v22 = vpop.f32.mrf.mxu2  ;;  %v308_v23 = vpop.f32.mrf.mxu3 }
  0xb1   : > { %v304_v24 = vadd.f32 %v303_v22, %v216_v18  ;;  %v309_v25 = vadd.f32 %v308_v23, %v218_v19  ;;  %v295_v26 = vpop.f32.mrf.mxu0  ;;  %v300_v27 = vpop.f32.mrf.mxu1 }
  0xb2   : > { %v296_v28 = vadd.f32 %v295_v26, %v213_v20  ;;  %v301_v29 = vadd.f32 %v300_v27, %v215_v21 }
  0xb3   : > { %318 = vst.msk [vmem:[%s694_s26 + $0x20] sm:$0xff] %vm313_vm2, %v304_v24 }
  0xb4   : > { %320 = vst.msk [vmem:[%s694_s26 + $0x30] sm:$0xff] %vm313_vm2, %v309_v25 }
  0xb5   : > { %315 = vst.msk [vmem:[%s694_s26 + $0x8] sm:$0xff] %vm313_vm2, %v296_v28 }
  0xb6   : > { %317 = vst.msk [vmem:[%s694_s26 + $0x18] sm:$0xff] %vm313_vm2, %v301_v29 }
  0xb8   : > { %v305_v32 = vpop.f32.mrf.mxu2  ;;  %v310_v33 = vpop.f32.mrf.mxu3 }
  0xb9   : > { %v306_v34 = vadd.f32 %v305_v32, %v217_v30  ;;  %v311_v35 = vadd.f32 %v310_v33, %v219_v31 }
  0xbb   : > { %319 = vst.msk [vmem:[%s694_s26 + $0x28] sm:$0xff] %vm313_vm2, %v306_v34 }
  0xbc   : > { %321 = vst.msk [vmem:[%s694_s26 + $0x38] sm:$0xff] %vm313_vm2, %v311_v35 }
  0xbd   : > { %554 = shalt.err (!%p551_p3)
}
  0xbe   : > { %s591_s19 = smov 128   ;;  %s592_s24 = smov 8  }
  0xbf   : > { %486 = dma.vmem_to_hbm [thread:$0]  (%p651_p5), %s336_s16, 1024, %s338_s5, %s323_s6, %s591_s19, %s591_s19, %s592_s24  }
  0xc0 PF: > { %p492_p4 = scmp.ge.s32.totalorder %s589_s15, 2  ;;  %s352_s25 = sand.u32 1, %s577_s12  }
  0xc1   : > { %s353_s27 = scalar_lea.sflag [#allocation3], %s352_s25 }
  0xc2   : > { %p489_p7 = pnand %p492_p4, %p655_p6 }
  0xc4   : > { %p490_p8 = pneg %p489_p7 }
  0xc6   : > { %572 = dma.done.wait (%p490_p8), %s353_s27, 1024  }
  0xc7   : > { %574 = vsyncadd (%p490_p8), %s353_s27, 4294966272  ;;  %p13_p9 = scmp.ge.s32.totalorder %s638_s18, 4   ;;  %s758_s12 = smov %s581_s13 }
  0xc8   : > { %s759_s13 = smov %s585_s14  ;;  %s760_s14 = smov %s649_s21 }
  0xc9   : > { %s761_s15 = smov %s638_s18  ;;  %15 = sbr.rel (!%p13_p9) target bundleno = 3 (0x3), region = 70 }
  0xce   :  { %359 = vsyncpa [#allocation3], 1 }
  0xcf   :  { %361 = vsyncpa [#allocation3 + $0x1], 1 }

</bundles_post_ra>
